<compile_context>
chip_gen: v7x
topology: tpu7x:2x2x1
jax: 0.10.0
libtpu: 0.0.40
codegen_flags: <defaults>
</compile_context>

<pallas_src>
import functools
import numpy as np
import jax
import jax.numpy as jnp
from jax import lax
from jax.experimental import pallas as pl
from jax.experimental.pallas import tpu as pltpu


# Explicit VMEM cap: fits v7x (64 MiB physical) with headroom.
# TODO(synk): raise on v5e/v6e (128 MiB VMEM) when scaling Sq / KV tiles.
_VMEM_LIMIT_BYTES = 48 * 1024 * 1024


def _single_buffered(block_shape, index_map):
    # Grid-invariant weights: request single buffering so they are not needlessly
    # double-buffered across the batch grid (pure VMEM savings).
    try:
        return pl.BlockSpec(block_shape, index_map, pipeline_mode=pl.Buffered(1))
    except TypeError:  # older jax without pipeline_mode: default buffering
        return pl.BlockSpec(block_shape, index_map)


# ----------------------------------------------------------------------------
# Scheduler: fused add_noise + scale_model_input
# ----------------------------------------------------------------------------

def _add_noise_kernel(coef_ref, x_ref, n_ref, o_ref):
    # noisy = (a * x + b * noise) * scale ; a/b/scale are per-batch SMEM scalars.
    b = pl.program_id(0)
    a = coef_ref[0, b]
    bb = coef_ref[1, b]
    s = coef_ref[2, b]
    o_ref[...] = (a * x_ref[...] + bb * n_ref[...]) * s


def add_noise_scale(x, noise, a, b, s):
    """Fused scheduler add_noise + scale_model_input.  x: (B, C, H, W)."""
    B = x.shape[0]
    N = int(np.prod(x.shape[1:]))
    coef = jnp.stack([
        jnp.broadcast_to(jnp.asarray(a, jnp.float32).reshape(-1), (B,)),
        jnp.broadcast_to(jnp.asarray(b, jnp.float32).reshape(-1), (B,)),
        jnp.broadcast_to(jnp.asarray(s, jnp.float32).reshape(-1), (B,)),
    ])                                                        # (3, B) -> SMEM
    if N % 128 == 0:
        R = N // 128
        br = R
        if R > 1024:                       # bound per-step VMEM; keep 8-aligned rows
            for cand in range(1024, 7, -8):
                if R % cand == 0:
                    br = cand
                    break
        shape3, block, grid = (B, R, 128), (1, br, 128), (B, R // br)
    else:
        shape3, block, grid = (B, 1, N), (1, 1, N), (B, 1)
    xf = x.reshape(shape3).astype(jnp.float32)
    nf = noise.reshape(shape3).astype(jnp.float32)
    out = pl.pallas_call(
        _add_noise_kernel,
        out_shape=jax.ShapeDtypeStruct(shape3, jnp.float32),
        grid=grid,
        in_specs=[
            pl.BlockSpec(memory_space=pltpu.MemorySpace.SMEM),
            pl.BlockSpec(block, lambda i, j: (i, j, 0)),
            pl.BlockSpec(block, lambda i, j: (i, j, 0)),
        ],
        out_specs=pl.BlockSpec(block, lambda i, j: (i, j, 0)),
        compiler_params=pltpu.CompilerParams(
            dimension_semantics=("parallel", "parallel")),
    )(coef, xf, nf)
    return out.reshape(x.shape)


# ----------------------------------------------------------------------------
# ramping_add:  enc = prompt + ramp[None, :, None] * clip   (emitted as bf16)
# ----------------------------------------------------------------------------

def _ramping_add_kernel(p_ref, c_ref, r_ref, o_ref):
    o_ref[...] = (p_ref[...] + r_ref[...] * c_ref[...]).astype(o_ref.dtype)


def ramping_add_pallas(prompt, clip, ramp):
    B, Sp, D = prompt.shape
    r = ramp.reshape(1, Sp, 1).astype(jnp.float32)
    return pl.pallas_call(
        _ramping_add_kernel,
        # bf16: attention casts the encoder states to bf16 anyway; halves HBM traffic.
        out_shape=jax.ShapeDtypeStruct((B, Sp, D), jnp.bfloat16),
        grid=(B,),
        in_specs=[
            pl.BlockSpec((1, Sp, D), lambda i: (i, 0, 0)),
            pl.BlockSpec((1, Sp, D), lambda i: (i, 0, 0)),
            pl.BlockSpec((1, Sp, 1), lambda i: (0, 0, 0)),
        ],
        out_specs=pl.BlockSpec((1, Sp, D), lambda i: (i, 0, 0)),
        compiler_params=pltpu.CompilerParams(dimension_semantics=("parallel",)),
    )(prompt.astype(jnp.float32), clip.astype(jnp.float32), r)


# ----------------------------------------------------------------------------
# Store-only 'w' pass: in-projection of the (noisy) reference latent tokens,
# consumed directly in the native (B, C, S) layout.
# ----------------------------------------------------------------------------

def _inproj_kernel(x_ref, w_ref, o_ref):
    o_ref[0] = lax.dot_general(
        x_ref[0].astype(jnp.bfloat16), w_ref[...].astype(jnp.bfloat16),
        dimension_numbers=(((0,), (0,)), ((), ())),
        preferred_element_type=jnp.float32).astype(o_ref.dtype)


def inproj_pallas(tokens_cs, w_in):
    """tokens_cs: (B, C, S) -> hidden (B, S, D) bf16 (the stored reference)."""
    B, C, S = tokens_cs.shape
    D = w_in.shape[1]
    return pl.pallas_call(
        _inproj_kernel,
        out_shape=jax.ShapeDtypeStruct((B, S, D), jnp.bfloat16),
        grid=(B,),
        in_specs=[pl.BlockSpec((1, C, S), lambda b: (b, 0, 0)),
                  _single_buffered((C, D), lambda b: (0, 0))],
        out_specs=pl.BlockSpec((1, S, D), lambda b: (b, 0, 0)),
        compiler_params=pltpu.CompilerParams(
            dimension_semantics=("parallel",),
            vmem_limit_bytes=_VMEM_LIMIT_BYTES),
    )(tokens_cs, w_in)


# ----------------------------------------------------------------------------
# Fused UNet stand-in kernel: in-proj + reference-only attn1 + attn2 + out-proj,
# all resident in VMEM.  One grid step per batch element.
# ----------------------------------------------------------------------------

def _mha(h, kv_chunks, wq_ref, wk_ref, wv_ref, wo_ref, num_heads):
    """Multi-head attention fully inside VMEM.

    h: (Sq, D) f32.  kv_chunks: list of (kv_array, score_bias_or_None).  The
    reference-only KV concat is realized as a streamed joint softmax over the
    chunks (online m/l/acc: no concatenated KV, one chunk's scores live at a
    time).  Q/K/V and the out-projection are single full-width (N = D) MXU
    matmuls; the softmax scale is pre-folded into Wq.  Returns (Sq, D) f32.
    """
    Sq, D = h.shape
    dh = D // num_heads
    h_bf = h.astype(jnp.bfloat16)

    # Fused projections (one MXU matmul per tensor, N = D).
    q = jnp.dot(h_bf, wq_ref[...].astype(jnp.bfloat16),
                preferred_element_type=jnp.float32).astype(jnp.bfloat16)
    proj = []
    for kv, bias in kv_chunks:
        kv_bf = kv.astype(jnp.bfloat16)
        k = jnp.dot(kv_bf, wk_ref[...].astype(jnp.bfloat16),
                    preferred_element_type=jnp.float32).astype(jnp.bfloat16)
        v = jnp.dot(kv_bf, wv_ref[...].astype(jnp.bfloat16),
                    preferred_element_type=jnp.float32).astype(jnp.bfloat16)
        proj.append((k, v, bias))

    head_outs = []
    for hd in range(num_heads):                      # static unroll; H is small
        lo, hi = hd * dh, (hd + 1) * dh
        q_h = q[:, lo:hi]
        m = l = acc = None
        for k, v, bias in proj:                      # online (m, l, acc) over chunks
            s = lax.dot_general(q_h, k[:, lo:hi],
                                dimension_numbers=(((1,), (1,)), ((), ())),
                                preferred_element_type=jnp.float32)
            if bias is not None:
                s = s + bias
            s_max = s.max(axis=-1, keepdims=True)
            if m is None:                            # first (self / enc) chunk
                m = s_max
                p = jnp.exp(s - m)
                l = p.sum(axis=-1, keepdims=True)
                acc = jnp.dot(p.astype(jnp.bfloat16), v[:, lo:hi],
                              preferred_element_type=jnp.float32)
            else:
                m_new = jnp.maximum(m, s_max)
                alpha = jnp.exp(m - m_new)
                p = jnp.exp(s - m_new)
                l = alpha * l + p.sum(axis=-1, keepdims=True)
                acc = alpha * acc + jnp.dot(p.astype(jnp.bfloat16), v[:, lo:hi],
                                            preferred_element_type=jnp.float32)
                m = m_new
        head_outs.append(acc * pl.reciprocal(l, approx=True))   # EUP slot

    # Head merge: lane concat (XLU) + ONE full-width out-projection matmul.
    attn = jnp.concatenate(head_outs, axis=-1).astype(jnp.bfloat16)   # (Sq, D)
    return jnp.dot(attn, wo_ref[...].astype(jnp.bfloat16),
                   preferred_element_type=jnp.float32)


def _fused_unet_kernel(ref_idx_ref, use_ref_ref, x_ref, enc_ref, ref_ref,
                       win_ref, wout_t_ref,
                       a1q, a1k, a1v, a1o, a2q, a2k, a2v, a2o,
                       o_ref, *, num_heads, is_cfg):
    del ref_idx_ref  # consumed by the reference BlockSpec index_map only

    # In-projection: tokens in native (C, S) layout (lane-dense on S), contract C.
    h = lax.dot_general(
        x_ref[0].astype(jnp.bfloat16), win_ref[...].astype(jnp.bfloat16),
        dimension_numbers=(((0,), (0,)), ((), ())),
        preferred_element_type=jnp.float32)                       # (S, D) f32

    # Batch 0 under CFG: disable the reference KV chunk with a -inf score bias
    # (exactly equivalent to not concatenating the reference for that batch).
    if is_cfg:
        ref_bias = jnp.where(use_ref_ref[pl.program_id(0)] > 0,
                             jnp.float32(0.0), jnp.float32(-1e30))
    else:
        ref_bias = None

    # attn1: reference-only self-attention, joint softmax over [self, ref] chunks.
    h = h + _mha(h, [(h, None), (ref_ref[0], ref_bias)],
                 a1q, a1k, a1v, a1o, num_heads)
    # attn2: cross-attention over the encoder hidden states.
    h = h + _mha(h, [(enc_ref[0], None)], a2q, a2k, a2v, a2o, num_heads)

    # Out-projection emitted directly as (C, S): lane-dense, unmasked stores.
    o_ref[0] = lax.dot_general(
        wout_t_ref[...].astype(jnp.bfloat16), h.astype(jnp.bfloat16),
        dimension_numbers=(((1,), (1,)), ((), ())),
        preferred_element_type=jnp.float32).astype(o_ref.dtype)


def _const2d_map(b, ri, uf):
    return (0, 0)


def fused_unet_pallas(tokens_cs, enc, ref, ref_idx, use_ref, params, num_heads,
                      *, is_cfg):
    """tokens_cs: (B, C, S); enc: (B, Sp, De); ref: (Br, Sr, D) bf16.
    ref_idx/use_ref: (B,) int32 scalar-prefetch (ref row + use-reference flag).
    Returns (B, C, S) bf16, lane-dense along S."""
    B, C, S = tokens_cs.shape
    Sp, De = enc.shape[1], enc.shape[2]
    Sr, Dr = ref.shape[1], ref.shape[2]

    weights = [
        params["w_in"], params["w_out_t"],
        params["attn1"]["wq"], params["attn1"]["wk"],
        params["attn1"]["wv"], params["attn1"]["wo"],
        params["attn2"]["wq"], params["attn2"]["wk"],
        params["attn2"]["wv"], params["attn2"]["wo"],
    ]

    in_specs = [
        pl.BlockSpec((1, C, S), lambda b, ri, uf: (b, 0, 0)),
        pl.BlockSpec((1, Sp, De), lambda b, ri, uf: (b, 0, 0)),
        pl.BlockSpec((1, Sr, Dr), lambda b, ri, uf: (ri[b], 0, 0)),
    ] + [_single_buffered(w.shape, _const2d_map) for w in weights]

    grid_spec = pltpu.PrefetchScalarGridSpec(
        num_scalar_prefetch=2,
        grid=(B,),
        in_specs=in_specs,
        out_specs=pl.BlockSpec((1, C, S), lambda b, ri, uf: (b, 0, 0)),
    )
    return pl.pallas_call(
        functools.partial(_fused_unet_kernel, num_heads=num_heads, is_cfg=is_cfg),
        out_shape=jax.ShapeDtypeStruct((B, C, S), jnp.bfloat16),
        grid_spec=grid_spec,
        compiler_params=pltpu.CompilerParams(
            dimension_semantics=("parallel",),
            vmem_limit_bytes=_VMEM_LIMIT_BYTES),
    )(ref_idx, use_ref, tokens_cs, enc, ref, *weights)


# ----------------------------------------------------------------------------
# Minimal UNet stand-in with ReferenceOnlyAttnProc semantics.
# ----------------------------------------------------------------------------

def tiny_unet_forward(sample, timestep, encoder_hidden_states, params,
                      cross_attention_kwargs, num_heads):
    del timestep  # TODO(synk): timestep embedding of the real UNet not reproduced.
    mode = cross_attention_kwargs["mode"]
    ref_dict = cross_attention_kwargs["ref_dict"]
    is_cfg = cross_attention_kwargs.get("is_cfg_guidance", False)
    name = "attn1.processor"

    B, C, H, W = sample.shape
    S = H * W
    tokens_cs = sample.reshape(B, C, S)          # native (B, C, S): no HBM transpose

    if mode == "w":
        # Store-only fast path: the 'w' forward's output is discarded in the
        # original; only the hidden states attn1 would see are materialized.
        h = inproj_pallas(tokens_cs, params["w_in"])            # (B, S, D) bf16
        ref_dict[name] = h[1:] if is_cfg else h
        return None

    if mode == "r":
        ref = ref_dict.pop(name)
    elif mode == "m":
        ref = ref_dict[name]
    else:
        raise AssertionError(mode)

    if is_cfg:
        # ref holds batches 1..B-1; batch 0 ignores it via the in-kernel mask.
        ref_idx = jnp.concatenate([jnp.zeros((1,), jnp.int32),
                                   jnp.arange(B - 1, dtype=jnp.int32)])
        use_ref = jnp.concatenate([jnp.zeros((1,), jnp.int32),
                                   jnp.ones((B - 1,), jnp.int32)])
    else:
        ref_idx = jnp.arange(B, dtype=jnp.int32)
        use_ref = jnp.ones((B,), jnp.int32)

    out = fused_unet_pallas(tokens_cs, encoder_hidden_states, ref, ref_idx,
                            use_ref, params, num_heads, is_cfg=is_cfg)
    return out.reshape(B, C, H, W)               # (B, C, S) -> NCHW: free reshape


# ----------------------------------------------------------------------------
# RefOnlyNoisedUNet
# ----------------------------------------------------------------------------

class RefOnlyNoisedUNetPallas:
    def __init__(self, params, num_heads=4, training=True,
                 num_train_timesteps=1000):
        self.params = params
        self.num_heads = num_heads
        self.training = training
        betas = jnp.linspace(1e-4, 0.02, num_train_timesteps, dtype=jnp.float32)
        alphas_cumprod = jnp.cumprod(1.0 - betas)
        # DDPMScheduler.add_noise coefficients.
        self.sqrt_ac = jnp.sqrt(alphas_cumprod)
        self.sqrt_1mac = jnp.sqrt(1.0 - alphas_cumprod)
        # TODO(synk): EulerAncestralDiscreteScheduler interpolates sigmas over
        # the inference schedule; timestep-indexed sigmas are an approximation.
        self.sigmas = jnp.sqrt((1.0 - alphas_cumprod) / alphas_cumprod)

    def ramping_add(self, encoder_hidden_states_prompt, cond_encoded_clip):
        return ramping_add_pallas(encoder_hidden_states_prompt,
                                  cond_encoded_clip, self.params["ramping"])

    def forward(self, sample, timestep, encoder_hidden_states_prompt=None,
                cond_encoded_clip=None, drop_idx=None, encoder_hidden_states=None,
                *, cross_attention_kwargs, noise_key,
                down_block_res_samples=None, mid_block_res_sample=None,
                ref_dict=None):
        if encoder_hidden_states_prompt is not None and encoder_hidden_states is None:
            encoder_hidden_states = self.ramping_add(encoder_hidden_states_prompt,
                                                     cond_encoded_clip)
        if drop_idx is not None:
            encoder_hidden_states = encoder_hidden_states.at[drop_idx].set(
                encoder_hidden_states_prompt[drop_idx].astype(
                    encoder_hidden_states.dtype))

        cond_lat = cross_attention_kwargs["cond_lat"]
        is_cfg_guidance = cross_attention_kwargs.get("is_cfg_guidance", False)

        noise = jax.random.normal(noise_key, cond_lat.shape, cond_lat.dtype)
        t = jnp.asarray(timestep).reshape(-1)
        if self.training:
            # DDPM add_noise; DDPM scale_model_input is identity.
            a = self.sqrt_ac[t]
            b = self.sqrt_1mac[t]
            s = jnp.ones_like(a)
        else:
            # EulerAncestral: x + sigma*noise ; then x / sqrt(sigma^2 + 1).
            sig = self.sigmas[t]
            a = jnp.ones_like(sig)
            b = sig
            s = 1.0 / jnp.sqrt(sig * sig + 1.0)
        noisy_cond_lat = add_noise_scale(cond_lat, noise, a, b, s)

        if ref_dict is None:
            ref_dict = {}
        # 'w' pass (store-only) on the noisy reference latent populates ref_dict.
        tiny_unet_forward(noisy_cond_lat, timestep, encoder_hidden_states,
                          self.params,
                          dict(mode="w", ref_dict=ref_dict,
                               is_cfg_guidance=is_cfg_guidance),
                          self.num_heads)
        # TODO(synk): down_block_additional_residuals / mid_block_additional_residual
        # injection of the real UNet is not reproduced.
        del down_block_res_samples, mid_block_res_sample

        pred = tiny_unet_forward(sample, timestep, encoder_hidden_states,
                                 self.params,
                                 dict(mode="r", ref_dict=ref_dict,
                                      is_cfg_guidance=is_cfg_guidance),
                                 self.num_heads)
        return pred


# ----------------------------------------------------------------------------
# Deterministic parameter construction + run
# ----------------------------------------------------------------------------

def make_params(key, C, D, De, Sp, num_heads):
    assert D % num_heads == 0
    dh = D // num_heads
    scale = 1.0 / float(np.sqrt(dh))
    ks = jax.random.split(key, 12)
    w = lambda k, shp: 0.02 * jax.random.normal(k, shp, jnp.float32)
    w_out = w(ks[1], (D, C))

    def attn(kq, kk, kv, ko, kv_dim):
        # to_q is (D, D) (queries come from the hidden state); only to_k/to_v
        # take the KV-source dim.  Softmax scale is folded into to_q.
        return {
            "wq": (w(kq, (D, D)) * scale).astype(jnp.bfloat16),
            "wk": w(kk, (kv_dim, D)).astype(jnp.bfloat16),
            "wv": w(kv, (kv_dim, D)).astype(jnp.bfloat16),
            "wo": w(ko, (D, D)).astype(jnp.bfloat16),
        }

    return {
        "ramping": jnp.linspace(0.0, 1.0, Sp, dtype=jnp.float32),
        "w_in": w(ks[0], (C, D)).astype(jnp.bfloat16),
        "w_out_t": jnp.transpose(w_out).astype(jnp.bfloat16),       # (C, D)
        "attn1": attn(ks[2], ks[3], ks[4], ks[5], D),
        "attn2": attn(ks[6], ks[7], ks[8], ks[9], De),
    }


if __name__ == "__main__":
    key = jax.random.PRNGKey(0)
    B, C, H, W = 2, 4, 16, 16      # latents (NCHW, as PyTorch)
    D, num_heads, Sp = 32, 4, 8    # model dim, heads, prompt sequence length

    kp, k1, k2, k3, k4, kn = jax.random.split(key, 6)
    params = make_params(kp, C, D, D, Sp, num_heads)

    sample = jax.random.normal(k1, (B, C, H, W), jnp.float32)
    cond_lat = jax.random.normal(k2, (B, C, H, W), jnp.float32)
    prompt = jax.random.normal(k3, (B, Sp, D), jnp.float32)
    clip = jax.random.normal(k4, (B, Sp, D), jnp.float32)
    timestep = jnp.array([10, 500], dtype=jnp.int32)

    model = RefOnlyNoisedUNetPallas(params, num_heads=num_heads, training=True)
    pred = model.forward(
        sample, timestep,
        encoder_hidden_states_prompt=prompt,
        cond_encoded_clip=clip,
        cross_attention_kwargs=dict(cond_lat=cond_lat, is_cfg_guidance=False),
        noise_key=kn,
    )
    pred = jax.block_until_ready(pred)
    assert pred.shape == (B, C, H, W)
    assert pred.dtype == jnp.bfloat16
    assert bool(jnp.all(jnp.isfinite(pred.astype(jnp.float32))))
    print("KERNEL_OK")
</pallas_src>

<mosaic_0001>
module attributes {stable_mosaic.version = 11 : i64} {
  func.func @_ramping_add_kernel(%arg0: i32, %arg1: memref<1x8x32xf32, #tpu.memory_space<vmem>>, %arg2: memref<1x8x32xf32, #tpu.memory_space<vmem>>, %arg3: memref<1x8x1xf32, #tpu.memory_space<vmem>>, %arg4: memref<1x8x32xbf16, #tpu.memory_space<vmem>>) attributes {dimension_semantics = [#tpu.dimension_semantics<parallel>], iteration_bounds = array<i64: 2>, scalar_prefetch = 0 : i64, scratch_operands = 0 : i64, tpu.core_type = #tpu.core_type<tc>, window_params = [{transform_indices = @transform_0, window_bounds = array<i64: 1, 8, 32>}, {transform_indices = @transform_1, window_bounds = array<i64: 1, 8, 32>}, {pipeline_mode = #tpu.pipeline_mode<synchronous>, transform_indices = @transform_2, window_bounds = array<i64: 1, 8, 1>}, {transform_indices = @transform_3, window_bounds = array<i64: 1, 8, 32>}]} {
    %c0 = arith.constant 0 : index
    %c0_0 = arith.constant 0 : index
    %c0_1 = arith.constant 0 : index
    %0 = vector.load %arg1[%c0, %c0_0, %c0_1] : memref<1x8x32xf32, #tpu.memory_space<vmem>>, vector<1x8x32xf32>
    %c0_2 = arith.constant 0 : index
    %c0_3 = arith.constant 0 : index
    %c0_4 = arith.constant 0 : index
    %1 = vector.load %arg3[%c0_2, %c0_3, %c0_4] : memref<1x8x1xf32, #tpu.memory_space<vmem>>, vector<1x8x1xf32>
    %c0_5 = arith.constant 0 : index
    %c0_6 = arith.constant 0 : index
    %c0_7 = arith.constant 0 : index
    %2 = vector.load %arg2[%c0_5, %c0_6, %c0_7] : memref<1x8x32xf32, #tpu.memory_space<vmem>>, vector<1x8x32xf32>
    %3 = vector.broadcast %1 : vector<1x8x1xf32> to vector<1x8x32xf32>
    %4 = arith.mulf %3, %2 : vector<1x8x32xf32>
    %5 = arith.addf %0, %4 : vector<1x8x32xf32>
    %6 = arith.truncf %5 : vector<1x8x32xf32> to vector<1x8x32xbf16>
    %c0_8 = arith.constant 0 : index
    %c0_9 = arith.constant 0 : index
    %c0_10 = arith.constant 0 : index
    %7 = vector.load %arg4[%c0_8, %c0_9, %c0_10] : memref<1x8x32xbf16, #tpu.memory_space<vmem>>, vector<1x8x32xbf16>
    tpu.vector_store %arg4[%c0_8, %c0_9, %c0_10], %6 {strides = array<i32>} : memref<1x8x32xbf16, #tpu.memory_space<vmem>>, vector<1x8x32xbf16>,
    return
  }
  func.func @transform_0(%arg0: i32) -> (i32, i32, i32) {
    %c0_i32 = arith.constant 0 : i32
    %c0_i32_0 = arith.constant 0 : i32
    %c0_i32_1 = arith.constant 0 : i32
    return %arg0, %c0_i32, %c0_i32_0 : i32, i32, i32
  }
  func.func @transform_1(%arg0: i32) -> (i32, i32, i32) {
    %c0_i32 = arith.constant 0 : i32
    %c0_i32_0 = arith.constant 0 : i32
    %c0_i32_1 = arith.constant 0 : i32
    return %arg0, %c0_i32, %c0_i32_0 : i32, i32, i32
  }
  func.func @transform_2(%arg0: i32) -> (i32, i32, i32) {
    %c0_i32 = arith.constant 0 : i32
    %c0_i32_0 = arith.constant 0 : i32
    %c0_i32_1 = arith.constant 0 : i32
    %c0_i32_2 = arith.constant 0 : i32
    return %c0_i32, %c0_i32_0, %c0_i32_1 : i32, i32, i32
  }
  func.func @transform_3(%arg0: i32) -> (i32, i32, i32) {
    %c0_i32 = arith.constant 0 : i32
    %c0_i32_0 = arith.constant 0 : i32
    %c0_i32_1 = arith.constant 0 : i32
    return %arg0, %c0_i32, %c0_i32_0 : i32, i32, i32
  }
}

</mosaic_0001>

<bundles_post_ra>
// kernel: tpu_custom_call.1
= control target key start
LH: loop header
LB: loop body
LE: loop exit
PB: predicated region body
PF: predicated region fallthrough
CT: control target
= control target key end

     0   :  { %8 = vsyncpa [#allocation3], 0  ;;  %s780_s0 = inlined_call_operand.hbm [shape: f32[2,8,32], index: 0, kind: input, shape index: {}]   ;;  %s781_s1 = inlined_call_operand.hbm [shape: f32[2,8,32], index: 1, kind: input, shape index: {}]   ;;  %s782_s2 = inlined_call_operand.vmem [shape: f32[1,8,1], index: 2, kind: input, shape index: {}]   ;;  %s783_s3 = inlined_call_operand.hbm [shape: bf16[2,8,32], index: 3, kind: output, shape index: {}]  }
   0x1   :  { %10 = vsyncpa [#allocation3 + $0x1], 0 }
   0x2   :  { %11 = vsyncpa [#allocation6], 0 }
   0x3   :  { %13 = vsyncpa [#allocation6 + $0x1], 0 }
   0x4   :  { %14 = vsyncpa [#allocation4], 0 }
   0x5   :  { %16 = vsyncpa [#allocation4 + $0x1], 0  ;;  %s567_s12 = smov 0   ;;  %s569_s13 = smov 0  }
   0x6   :  { %s571_s14 = smov 0   ;;  %s573_s15 = smov 0  }
   0x7 LB: > { %s588_s16 = sadd.s32 4294967295, %s541_s15   ;;  %s343_s17 = sadd.s32 4294967294, %s541_s15   ;;  %s541_s15 = sphi %s573_s15, %s802_s15   ;;  %s537_s14 = sphi %s571_s14, %s801_s14   ;;  %s533_s13 = sphi %s569_s13, %s800_s13   ;;  %s529_s12 = sphi %s567_s12, %s799_s12  }
   0x8   : > { %s592_s18 = sadd.s32 1, %s541_s15   ;;  %s29_s19 = sadd.s32 1, %s537_s14 }
   0x9   : > { %s26_s20 = ssub.s32 %s541_s15, %s592_s18  ;;  %p36_p0 = scmp.ne.s32.totalorder %s537_s14, %s533_s13 }
   0xa   : > { %p27_p1 = scmp.eq.s32.totalorder %s26_s20, 0  ;;  %p37_p2 = scmp.eq.s32.totalorder %s541_s15, 0 }
   0xb   : > { %p42_p3 = scmp.ne.s32.totalorder %s533_s13, %s529_s12  ;;  %p43_p4 = scmp.eq.s32.totalorder %s588_s16, 0 }
   0xc   : > { %s604_s21 = scalar_select %p27_p1, %s537_s14, %s29_s19  }
   0xd   : > { %p606_p5 = por %p37_p2, %p36_p0  ;;  %p610_p6 = por %p43_p4, %p42_p3 }
   0xe   : > { %p113_p7 = scmp.eq.s32.totalorder %s588_s16, 1  ;;  %p119_p8 = scmp.eq.s32.totalorder %s343_s17, 1 }
   0xf   : > { %s787_s23 = scalar_select %p610_p6, 1, 0 }
  0x10   : > { %p375_p10 = scmp.lt.s32.totalorder %s541_s15, 2  ;;  %p617_p11 = por %p113_p7, %p36_p0 }
  0x11   : > { %p621_p12 = por %p119_p8, %p42_p3  ;;  %s626_s26 = sand.u32 1, %s537_s14  }
  0x12   : > { %s788_s24 = scalar_select %p617_p11, 1, 0 }
  0x13   : > { %s789_s25 = scalar_select %p621_p12, 1, 0 }
  0x14   : > { %s347_s27 = sshll.u32 %s541_s15, 7  ;;  %s346_s28 = sshll.u32 %s626_s26, 3 }
  0x15   : > { %s635_s4 = scalar_lea.hbm %s780_s0, %s347_s27  ;;  %s146_s5 = scalar_lea.vmem [#allocation2], %s346_s28 }
  0x16   : > { %s153_s6 = sshll.u32 %s146_s5, 4  ;;  %p641_p13 = pnand %p375_p10, %p606_p5  ;;  %s645_s6 = int_to_ptr.vmem [resolvable:$true] %s153_s6 }
  0x17   : > { %s143_s8 = scalar_lea.sflag [#allocation3], %s626_s26  ;;  %s411_s9 = scalar_lea.hbm %s635_s4, 128 }
  0x18   : > { %p412_p2 = scmp.ne.s32.totalorder %s635_s4, %s411_s9  ;;  %p413_p3 = pneg %p641_p13 }
  0x19   : > { %s416_s17 = scalar_lea.hbm %s780_s0, 256  ;;  %p417_p5 = scmp.lt.u32.totalorder %s635_s4, %s780_s0 }
  0x1a   : > { %p414_p4 = pnand %p413_p3, %p412_p2  ;;  %p418_p8 = scmp.lt.u32.totalorder %s416_s17, %s411_s9 }
  0x1b   : > { %p420_p9 = scmp.lt.u32.totalorder %s411_s9, %s635_s4 }
  0x1c   : > { %p415_p7 = pneg %p414_p4  ;;  %p419_p10 = por %p418_p8, %p417_p5 }
  0x1e   : > { %p421_p0 = por %p420_p9, %p419_p10 }
  0x20   : > { %p422_p1 = pnand %p421_p0, %p415_p7 }
  0x22   : > { %425 = shalt.err (!%p422_p1)
}
  0x23   : > { %s426_s22 = scalar_lea.vmem %s645_s6, 128  ;;  %s543_s29 = smov [#allocation2]  }
  0x24   : > { %p427_p2 = scmp.ne.s32.totalorder %s645_s6, %s426_s22  ;;  %s431_s30 = sshll.u32 %s543_s29, 4  ;;  %s432_s30 = int_to_ptr.vmem [resolvable:$false] %s431_s30 }
  0x25   : > { %s433_s5 = scalar_lea.vmem %s432_s30, 256  ;;  %p434_p11 = scmp.lt.s32.totalorder %s645_s6, %s432_s30 }
  0x26   : > { %p429_p4 = pnand %p427_p2, %p413_p3  ;;  %p435_p5 = scmp.lt.s32.totalorder %s433_s5, %s426_s22 }
  0x28   : > { %p430_p12 = pneg %p429_p4  ;;  %p436_p8 = por %p435_p5, %p434_p11 }
  0x2a   : > { %p437_p9 = pnand %p436_p8, %p430_p12 }
  0x2c   : > { %440 = shalt.err (!%p437_p9)
}
  0x2d   : > { %367 = dma.hbm_to_vmem [thread:$0]  (!%p641_p13), %s635_s4, 128, %s645_s6, %s143_s8  }
  0x2e   : > { %p791_p0 = scmp.lt.s32.totalorder %s541_s15, 3  ;;  %p792_p1 = scmp.ge.s32.totalorder %s541_s15, 1 }
  0x2f   : > { %s688_s17 = scalar_lea.hbm %s781_s1, %s347_s27  ;;  %s164_s19 = scalar_lea.vmem [#allocation5], %s346_s28 }
  0x30   : > { %p679_p7 = pnand %p792_p1, %p791_p0  ;;  %s171_s20 = sshll.u32 %s164_s19, 4  ;;  %s172_s20 = int_to_ptr.vmem [resolvable:$true] %s171_s20 }
  0x31   : > { %s161_s4 = scalar_lea.sflag [#allocation6], %s626_s26  ;;  %s441_s6 = scalar_lea.hbm %s688_s17, 128 }
  0x32   : > { %s793_s9 = scalar_select %p679_p7, 1, 0 }
  0x33   : > { %p442_p11 = scmp.ne.s32.totalorder %s688_s17, %s441_s6  ;;  %s446_s27 = scalar_lea.hbm %s781_s1, 256 }
  0x34   : > { %p447_p2 = scmp.lt.u32.totalorder %s688_s17, %s781_s1  ;;  %p448_p4 = scmp.lt.u32.totalorder %s446_s27, %s441_s6 }
  0x35   : > { %p444_p12 = pnand %p442_p11, %p413_p3  ;;  %p450_p8 = scmp.lt.u32.totalorder %s441_s6, %s688_s17 }
  0x36   : > { %p449_p5 = por %p448_p4, %p447_p2 }
  0x37   : > { %p445_p10 = pneg %p444_p12 }
  0x38   : > { %p451_p9 = por %p450_p8, %p449_p5 }
  0x3a   : > { %p452_p0 = pnand %p451_p9, %p445_p10 }
  0x3c   : > { %455 = shalt.err (!%p452_p0)
}
  0x3d   : > { %s456_s26 = scalar_lea.vmem %s172_s20, 128  ;;  %s544_s28 = smov [#allocation5]  }
  0x3e   : > { %p457_p1 = scmp.ne.s32.totalorder %s172_s20, %s456_s26  ;;  %s461_s5 = sshll.u32 %s544_s28, 4  ;;  %s462_s5 = int_to_ptr.vmem [resolvable:$false] %s461_s5 }
  0x3f   : > { %s463_s10 = scalar_lea.vmem %s462_s5, 256  ;;  %p464_p6 = scmp.lt.s32.totalorder %s172_s20, %s462_s5 }
  0x40   : > { %p459_p11 = pnand %p457_p1, %p413_p3  ;;  %p465_p7 = scmp.lt.s32.totalorder %s463_s10, %s456_s26 }
  0x42   : > { %p460_p12 = pneg %p459_p11  ;;  %p466_p2 = por %p465_p7, %p464_p6 }
  0x44   : > { %p467_p4 = pnand %p466_p2, %p460_p12 }
  0x46   : > { %470 = shalt.err (!%p467_p4)
}
  0x47   : > { %370 = dma.hbm_to_vmem [thread:$0]  (!%p641_p13), %s688_s17, 128, %s172_s20, %s161_s4  }
  0x48   : > { %p794_p10 = scmp.ne.s32.totalorder %s793_s9, 0 }
  0x49   : > { %s715_s11 = sand.u32 (!%p794_p10), 1, %s533_s13   ;;  %p795_p3 = scmp.ne.s32.totalorder (!%p794_p10), %s787_s23, 0 }
  0x4a   : > { %180 = sbr.rel (%p794_p10) target bundleno = 234 (0xea), region = 32  ;;  %s351_s19 = sshll.u32 (!%p794_p10), %s715_s11, 3 }
  0x4b   : > { %s183_s6 = scalar_lea.sflag (!%p794_p10), [#allocation3], %s715_s11  ;;  %s186_s8 = scalar_lea.vmem (!%p794_p10), [#allocation2], %s351_s19 }
  0x51   : > { %516 = dma.done.wait (%p795_p3), %s183_s6, 128  }
  0x52   : > { %518 = vsyncadd (%p795_p3), %s183_s6, 4294967168  ;;  %s192_s7 = scalar_lea.sflag [#allocation6], %s715_s11  ;;  %s195_s17 = scalar_lea.vmem [#allocation5], %s351_s19 }
  0x53   : > { %520 = dma.done.wait (%p795_p3), %s192_s7, 128  }
  0x54   : > { %522 = vsyncadd (%p795_p3), %s192_s7, 4294967168  ;;  %v545_v0 = vmov 0   ;;  %v224_v1 = vld [vmem:[%s782_s2] sm:$0xff]  ;;  %s353_s4 = sshll.u32 %s715_s11, 2  ;;  %v225_v2 = vld [vmem:[%s195_s17] sm:$0xff]  ;;  %s355_s22 = sshll.u32 %s588_s16, 6 }
  0x55   : > { %410 = vset.pattern.permute.xlu0 %v545_v0  ;;  %v223_v4 = vld [vmem:[%s186_s8] sm:$0xff]  ;;  %s222_s27 = scalar_lea.vmem [#allocation7], %s353_s4  ;;  %vm234_vm0 = vcmask 257024   ;;  %s736_s26 = scalar_lea.hbm %s783_s3, %s355_s22 }
  0x56   : > { %228 = vperm.xlu0 %410, %v224_v1   ;;  %s250_s23 = sshll.u32 %s222_s27, 4  ;;  %s237_s28 = scalar_lea.sflag [#allocation4], %s715_s11  ;;  %s738_s23 = int_to_ptr.vmem [resolvable:$true] %s250_s23 }
  0x57   : > { %s471_s5 = scalar_lea.vmem %s738_s23, 64  ;;  %p796_p13 = scmp.ne.s32.totalorder %s788_s24, 0 }
  0x58   : > { %p472_p6 = scmp.ne.s32.totalorder %s738_s23, %s471_s5  ;;  %s546_s16 = smov [#allocation7]  }
  0x59   : > { %s475_s10 = sshll.u32 %s546_s16, 4  ;;  %s476_s10 = int_to_ptr.vmem [resolvable:$false] %s475_s10 }
  0x5a   : > { %p473_p7 = pnand %p472_p6, %p796_p13  ;;  %s477_s19 = scalar_lea.vmem %s476_s10, 128 }
  0x5b   : > { %p478_p8 = scmp.lt.s32.totalorder %s738_s23, %s476_s10  ;;  %p479_p9 = scmp.lt.s32.totalorder %s477_s19, %s471_s5 }
  0x5c   : > { %p474_p5 = pneg %p473_p7 }
  0x5d   : > { %p480_p0 = por %p479_p9, %p478_p8 }
  0x5f   : > { %p481_p1 = pnand %p480_p0, %p474_p5 }
  0xd5   : > { %v229_v3 = vpop.permute.xlu0 %228 }
  0xd6   : > { %v231_v5 = vmul.f32 %v229_v3, %v225_v2 }
  0xd8   : > { %v232_v6 = vadd.f32 %v231_v5, %v223_v4 }
  0xda   : > { %v233_v7 = vpack.c.bf16 %v232_v6, %v232_v6 }
  0xdc   : > { %235 = vst.msk [vmem:[%s222_s27] sm:$0xf] %vm234_vm0, %v233_v7 }
  0xdd   : > { %484 = shalt.err (!%p481_p1)
}
  0xde   : > { %s485_s11 = scalar_lea.hbm %s736_s26, 64  ;;  %s489_s7 = scalar_lea.hbm %s783_s3, 128 }
  0xdf   : > { %p486_p11 = scmp.ne.s32.totalorder %s736_s26, %s485_s11  ;;  %p490_p4 = scmp.lt.u32.totalorder %s736_s26, %s783_s3 }
  0xe0   : > { %p491_p10 = scmp.lt.u32.totalorder %s489_s7, %s485_s11  ;;  %p493_p6 = scmp.lt.u32.totalorder %s485_s11, %s736_s26 }
  0xe1   : > { %p487_p12 = pnand %p486_p11, %p796_p13 }
  0xe2   : > { %p492_p3 = por %p491_p10, %p490_p4 }
  0xe3   : > { %p488_p2 = pneg %p487_p12 }
  0xe4   : > { %p494_p7 = por %p493_p6, %p492_p3 }
  0xe6   : > { %p495_p5 = pnand %p494_p7, %p488_p2 }
  0xe8   : > { %498 = shalt.err (!%p495_p5)
}
  0xe9   : > { %362 = dma.vmem_to_hbm [thread:$0]  (%p796_p13), %s738_s23, 64, %s736_s26, %s237_s28  }
  0xea PF: > { %s262_s20 = sand.u32 1, %s529_s12   ;;  %p797_p8 = scmp.ne.s32.totalorder %s789_s25, 0 }
  0xeb   : > { %p798_p9 = scmp.ge.s32.totalorder %s541_s15, 2  ;;  %s263_s4 = scalar_lea.sflag [#allocation4], %s262_s20 }
  0xed   : > { %p372_p0 = pnand %p798_p9, %p797_p8 }
  0xef   : > { %524 = dma.done.wait (!%p372_p0), %s263_s4, 64  }
  0xf0   : > { %526 = vsyncadd (!%p372_p0), %s263_s4, 4294967232  ;;  %p19_p1 = scmp.ge.s32.totalorder %s592_s18, 4   ;;  %s799_s12 = smov %s533_s13 }
  0xf1   : > { %s800_s13 = smov %s537_s14  ;;  %s801_s14 = smov %s604_s21 }
  0xf2   : > { %s802_s15 = smov %s592_s18  ;;  %21 = sbr.rel (!%p19_p1) target bundleno = 7 (0x7), region = 90 }
  0xf9   :  { %268 = vsyncpa [#allocation3], 1 }
  0xfa   :  { %270 = vsyncpa [#allocation3 + $0x1], 1 }
  0xfb   :  { %271 = vsyncpa [#allocation6], 1 }
  0xfc   :  { %273 = vsyncpa [#allocation6 + $0x1], 1 }
  0xfd   :  { %274 = vsyncpa [#allocation4], 1 }
  0xfe   :  { %276 = vsyncpa [#allocation4 + $0x1], 1 }

</bundles_post_ra>
